<compile_context>
chip_gen: v7x
topology: tpu7x:2x2x1
jax: 0.10.0
libtpu: 0.0.40
codegen_flags: <defaults>
</compile_context>

<pallas_src>
import jax
import jax.numpy as jnp
from jax.experimental import pallas as pl
from jax.experimental.pallas import tpu as pltpu


# ----------------------------- glue (rearranges) -----------------------------

def space_to_depth(x, blk):
    # 'B C (h b1) (w b2) -> B h w (C b1 b2)'
    B, C, H, W = x.shape
    h, w = H // blk, W // blk
    xb = x.reshape(B, C, h, blk, w, blk)
    xb = jnp.transpose(xb, (0, 2, 4, 1, 3, 5))
    return xb.reshape(B, h, w, C * blk * blk)


def depth_to_space(xb, blk, C):
    # 'B h w (C b1 b2) -> B C (h b1) (w b2)'
    B, h, w, _ = xb.shape
    x = xb.reshape(B, h, w, C, blk, blk)
    x = jnp.transpose(x, (0, 3, 1, 4, 2, 5))
    return x.reshape(B, C, h * blk, w * blk)


def _round_up(a, b):
    return (a + b - 1) // b * b


def _num_tensorcores():
    """Best-effort TensorCore count (2 on v7x, 1 on v5e/v6e); safe fallback 1."""
    try:
        info = pltpu.get_tpu_info()
        for name in ("num_cores", "core_count", "num_tensorcores", "tensorcore_count"):
            v = getattr(info, name, None)
            if isinstance(v, int) and v > 0:
                return v
    except Exception:
        pass
    return 1


def _vmem_capacity_bytes():
    try:
        return int(pltpu.get_tpu_info().vmem_capacity_bytes)
    except Exception:
        return 96 << 20  # conservative fallback below any generation's physical VMEM


def _compiler_params(sem, vmem_bytes_estimate):
    limit = max(32 << 20, int(vmem_bytes_estimate * 1.25) + (2 << 20))
    limit = min(limit, _vmem_capacity_bytes())
    return pltpu.CompilerParams(dimension_semantics=sem, vmem_limit_bytes=limit)


def _pick_row_tile(n_rows, tn_max, num_cores=1):
    """Row tile (multiple of 16 for bf16 sublane packing) + padded row count.

    Single-TC chips (v5e/v6e): one big tile (no forced split, denser stores).
    Multi-TC chips (v7x): aim for >= 2 grid steps per TensorCore so the
    BlockSpec pipeline still overlaps DMA with compute on each core.
    """
    n16 = _round_up(max(n_rows, 16), 16)
    tn = min(_round_up(tn_max, 16), n16)
    if num_cores > 1:
        target_tiles = 2 * num_cores
        if n16 >= 16 * target_tiles:
            tn = min(tn, _round_up(-(-n16 // target_tiles), 16))
    n_pad = _round_up(n16, tn)
    return tn, n_pad


def _pick_col_tile(n_cols, tj_max=1024):
    """Output-column tile for the fused [psi | phi.T] dot (bounds rhs VMEM tile)."""
    if n_cols <= tj_max:
        return n_cols
    for tj in (1024, 512, 256, 128):
        if tj <= tj_max and n_cols % tj == 0:
            return tj
    return n_cols


# ----------------------------- Pallas kernels --------------------------------

def _sampling_kernel(x_ref, phi_ref, psi_init_ref, y_ref, x0init_ref, sal_ref):
    # y_full   = x_blocks @ phi                     (== concat(y_init, y_next))
    # x0_init  = y_full[:, :M_init] @ psi_init      (psi rows >= nB_init zeroed,
    #                                                so == y_init @ psi[:nB_init])
    # sal      = per-row std of x0_init             (free XLU/VPU filler)
    x = x_ref[...]                                                     # [TN, K] bf16
    y = jnp.dot(x, phi_ref[...], preferred_element_type=jnp.float32)  # [TN, Mp] f32
    yb = y.astype(jnp.bfloat16)
    y_ref[...] = yb                                                    # bf16 store

    m_init = psi_init_ref.shape[0]                                     # static
    x0 = jnp.dot(yb[:, :m_init], psi_init_ref[...],
                 preferred_element_type=jnp.float32)                   # [TN, K] f32
    x0init_ref[...] = x0

    mean = jnp.mean(x0, axis=-1, keepdims=True)
    var = jnp.mean((x0 - mean) ** 2, axis=-1, keepdims=True)
    sal_ref[...] = jnp.sqrt(var)                                       # [TN, 1]


def _recon_kernel(yfull_ref, counts_ref, rhs_ref, y_ref, x0cat_ref):
    # mask built in-kernel as a predicate from per-block counts
    # y          = where(col < counts, y_full, 0)
    # [x0, x0_T] = y @ [psi | phi.T]      (single MXU dot, lane-dense output,
    #                                      optionally column-tiled along axis 1)
    j = pl.program_id(1)
    yf = yfull_ref[...]                                                # [TN, Mp] bf16
    col = jax.lax.broadcasted_iota(jnp.int32, yf.shape, 1)
    pred = col < counts_ref[...]                                       # counts [TN,1]
    y_bf = jnp.where(pred, yf, jnp.zeros_like(yf))

    @pl.when(j == 0)
    def _():
        y_ref[...] = y_bf.astype(jnp.float32)                          # resident over j

    x0cat_ref[...] = jnp.dot(y_bf, rhs_ref[...],
                             preferred_element_type=jnp.float32)       # [TN, TJ]


def sampling_pallas(x_blocks, phi, psi_init, tn):
    n_pad, K = x_blocks.shape
    M_pad = phi.shape[1]
    M_init = psi_init.shape[0]
    vmem_est = (2 * tn * K * 2          # x in (bf16, double-buffered)
                + K * M_pad * 2         # phi (bf16, single-buffered)
                + M_init * K * 2        # psi_init (bf16, single-buffered)
                + 2 * tn * M_pad * 2    # y_full out (bf16, double-buffered)
                + 2 * tn * K * 4        # x0_init out (f32, double-buffered)
                + 2 * tn * 4)           # sal out
    return pl.pallas_call(
        _sampling_kernel,
        out_shape=(jax.ShapeDtypeStruct((n_pad, M_pad), jnp.bfloat16),
                   jax.ShapeDtypeStruct((n_pad, K), jnp.float32),
                   jax.ShapeDtypeStruct((n_pad, 1), jnp.float32)),
        grid=(n_pad // tn,),
        in_specs=[pl.BlockSpec((tn, K), lambda i: (i, 0)),
                  pl.BlockSpec((K, M_pad), lambda i: (0, 0),
                               pipeline_mode=pl.Buffered(1)),
                  pl.BlockSpec((M_init, K), lambda i: (0, 0),
                               pipeline_mode=pl.Buffered(1))],
        out_specs=(pl.BlockSpec((tn, M_pad), lambda i: (i, 0)),
                   pl.BlockSpec((tn, K), lambda i: (i, 0)),
                   pl.BlockSpec((tn, 1), lambda i: (i, 0))),
        compiler_params=_compiler_params(("parallel",), vmem_est),
    )(x_blocks, phi, psi_init)


def recon_pallas(y_full, counts, rhs, tn):
    n_pad, M_pad = y_full.shape
    K2 = rhs.shape[1]
    tj = _pick_col_tile(K2)
    n_j = K2 // tj
    # rhs: single-buffer when it is grid-invariant (n_j == 1); otherwise default
    # double-buffering with a bounded (M_pad, tj) tile so it still fits v7x VMEM.
    if n_j == 1:
        rhs_spec = pl.BlockSpec((M_pad, tj), lambda i, j: (0, j),
                                pipeline_mode=pl.Buffered(1))
        rhs_bufs = 1
    else:
        rhs_spec = pl.BlockSpec((M_pad, tj), lambda i, j: (0, j))
        rhs_bufs = 2
    vmem_est = (2 * tn * M_pad * 2          # y_full in (bf16)
                + 2 * tn * 4                # counts in
                + rhs_bufs * M_pad * tj * 2 # rhs tile(s)
                + 2 * tn * M_pad * 4        # y out (f32)
                + 2 * tn * tj * 4)          # x0cat out tile
    return pl.pallas_call(
        _recon_kernel,
        out_shape=(jax.ShapeDtypeStruct((n_pad, M_pad), jnp.float32),
                   jax.ShapeDtypeStruct((n_pad, K2), jnp.float32)),
        grid=(n_pad // tn, n_j),
        in_specs=[pl.BlockSpec((tn, M_pad), lambda i, j: (i, 0)),
                  pl.BlockSpec((tn, 1), lambda i, j: (i, 0)),
                  rhs_spec],
        out_specs=(pl.BlockSpec((tn, M_pad), lambda i, j: (i, 0)),
                   pl.BlockSpec((tn, tj), lambda i, j: (i, j))),
        compiler_params=_compiler_params(("parallel", "arbitrary"), vmem_est),
    )(y_full, counts, rhs)


# ----------------------------- forward (AdaptiveSampling) --------------------

def adaptive_sampling_forward(x, phi, psi, sr, blk, tn_max=512):
    B, C, H, W = x.shape
    xb4 = space_to_depth(x, blk)                        # [B, h, w, K]
    _, h, w, K = xb4.shape
    N = B * h * w
    M = phi.shape[1]
    M_pad = _round_up(M, 128)                           # lane-dense y / y_full tiles

    nB = int(blk * blk * sr)
    sr_base_ratio = 0.5 if sr < 0.2 else 0.3333         # get_sr_base_ratio
    nB_init = int(nB * sr_base_ratio)
    M_init = min(_round_up(max(nB_init, 1), 128), M_pad)

    tn, n_pad = _pick_row_tile(N, tn_max, _num_tensorcores())

    x_blocks = xb4.reshape(N, K)
    x_blocks_p = jnp.pad(x_blocks, ((0, n_pad - N), (0, 0))).astype(jnp.bfloat16)

    phi_p = jnp.pad(phi, ((0, 0), (0, M_pad - M)))
    psi_p = jnp.pad(psi, ((0, M_pad - M), (0, 0)))
    phi_bf = phi_p.astype(jnp.bfloat16)                 # [K, M_pad]
    # first M_init rows of psi, rows >= nB_init zeroed  == psi[:nB_init] contraction
    row_keep = (jnp.arange(M_init) < nB_init)[:, None]
    psi_init_bf = jnp.where(row_keep, psi_p[:M_init], 0.0).astype(jnp.bfloat16)

    # hot path 1: full measurements + initial reconstruction + in-kernel saliency
    y_full_p, x0_init_p, sal_p = sampling_pallas(x_blocks_p, phi_bf, psi_init_bf, tn)
    x0_init_blocks = x0_init_p[:N]

    # TODO(synk): Traditional/Std/Diff saliency models are not defined in the
    # provided source; use a deterministic per-block-std measurement allocation
    # as a stand-in for self.saliency_model(x0_init, sr, mask=True).
    sal = sal_p[:N, 0]
    wts = sal / (jnp.sum(sal) + 1e-8)
    extra = float(nB * N - nB_init * N)
    counts = jnp.clip(nB_init + jnp.floor(extra * wts), 0, M).astype(jnp.int32)  # [N]
    counts_p = jnp.pad(counts, (0, n_pad - N)).reshape(n_pad, 1)

    # fused RHS for both reconstructions: [psi | phi.T]  ([M_pad, 2K])
    rhs_bf = jnp.concatenate([psi_p, jnp.transpose(phi_p)], axis=-1).astype(jnp.bfloat16)

    # hot path 2: in-kernel predicate mask + both reconstructions in one MXU dot
    y_p, x0cat_p = recon_pallas(y_full_p, counts_p, rhs_bf, tn)

    y = y_p[:N, :M]
    # y_mask is just counts vs iota: trivial fused XLA compare, no kernel store
    y_mask = (jnp.arange(M)[None, :] < counts[:, None]).astype(jnp.float32)
    x0_blocks = x0cat_p[:N, :K]
    x0T_blocks = x0cat_p[:N, K:2 * K]

    x0_init = depth_to_space(x0_init_blocks.reshape(B, h, w, K), blk, C)
    x0 = depth_to_space(x0_blocks.reshape(B, h, w, K), blk, C)
    x0_T = depth_to_space(x0T_blocks.reshape(B, h, w, K), blk, C)

    return {
        'x0': x0,                                 # [B, C, H, W]
        'y': y.reshape(B, h, w, M),               # [B, h, w, M]
        'y_mask': y_mask.reshape(B, h, w, M),     # [B, h, w, M]
        'x0_init': x0_init,                       # [B, C, H, W]
        'x0_T': x0_T,                             # [B, C, H, W]
    }


# ----------------------------- main -------------------------------------------

if __name__ == "__main__":
    blk = 16
    sr = 0.25
    B, C, H, W = 2, 1, 64, 64                 # N = B*(H/blk)*(W/blk) = 32 blocks

    K = C * blk * blk                         # 256
    M = int(blk * blk * sr * 2)               # 128 (load_phi_psi(blk, sr*2))

    key = jax.random.PRNGKey(0)
    kx, km = jax.random.split(key)
    x = jax.random.normal(kx, (B, C, H, W), dtype=jnp.float32)

    # deterministic synthetic sensing matrix (stands in for load_phi_psi)
    matrix = jax.random.normal(km, (M, K), dtype=jnp.float32) / jnp.sqrt(K)
    phi = jnp.transpose(matrix)               # [K, M]   (self.phi = matrix.T)
    psi = matrix                              # [M, K]   (self.psi = matrix)

    res = adaptive_sampling_forward(x, phi, psi, sr, blk)
    res = jax.block_until_ready(res)

    h, w = H // blk, W // blk
    assert res['x0'].shape == (B, C, H, W)
    assert res['x0_T'].shape == (B, C, H, W)
    assert res['x0_init'].shape == (B, C, H, W)
    assert res['y'].shape == (B, h, w, M)
    assert res['y_mask'].shape == (B, h, w, M)
    assert all(bool(jnp.all(jnp.isfinite(v))) for v in res.values())

    # loose numerical check against an f32 reference of the bf16-rounded inputs
    hp = jax.lax.Precision.HIGHEST
    xb_r = space_to_depth(x, blk).reshape(-1, K).astype(jnp.bfloat16).astype(jnp.float32)
    phi_r = phi.astype(jnp.bfloat16).astype(jnp.float32)
    psi_r = psi.astype(jnp.bfloat16).astype(jnp.float32)
    y_full_ref = jnp.dot(xb_r, phi_r, precision=hp)
    y_full_bf = y_full_ref.astype(jnp.bfloat16).astype(jnp.float32)   # bf16 inter-kernel
    mask_ref = res['y_mask'].reshape(-1, M)
    y_ref = y_full_bf * mask_ref
    yb_ref = y_ref.astype(jnp.bfloat16).astype(jnp.float32)
    x0_ref_blocks = jnp.dot(yb_ref, psi_r, precision=hp)
    x0T_ref_blocks = jnp.dot(yb_ref, jnp.transpose(phi_r), precision=hp)
    x0_ref = depth_to_space(x0_ref_blocks.reshape(B, h, w, K), blk, C)
    x0T_ref = depth_to_space(x0T_ref_blocks.reshape(B, h, w, K), blk, C)
    assert float(jnp.max(jnp.abs(res['y'].reshape(-1, M) - y_ref))) < 5e-2
    assert float(jnp.max(jnp.abs(res['x0'] - x0_ref))) < 5e-2
    assert float(jnp.max(jnp.abs(res['x0_T'] - x0T_ref))) < 5e-2

    print("KERNEL_OK")
</pallas_src>

<mosaic_0001>
module attributes {stable_mosaic.version = 11 : i64} {
  func.func @_sampling_kernel(%arg0: i32, %arg1: memref<32x256xbf16, #tpu.memory_space<vmem>>, %arg2: memref<256x128xbf16, #tpu.memory_space<vmem>>, %arg3: memref<128x256xbf16, #tpu.memory_space<vmem>>, %arg4: memref<32x128xbf16, #tpu.memory_space<vmem>>, %arg5: memref<32x256xf32, #tpu.memory_space<vmem>>, %arg6: memref<32x1xf32, #tpu.memory_space<vmem>>) attributes {dimension_semantics = [#tpu.dimension_semantics<parallel>], iteration_bounds = array<i64: 1>, scalar_prefetch = 0 : i64, scratch_operands = 0 : i64, tpu.core_type = #tpu.core_type<tc>, window_params = [{transform_indices = @transform_0, window_bounds = array<i64: 32, 256>}, {pipeline_mode = #tpu.pipeline_mode<synchronous>, transform_indices = @transform_1, window_bounds = array<i64: 256, 128>}, {pipeline_mode = #tpu.pipeline_mode<synchronous>, transform_indices = @transform_2, window_bounds = array<i64: 128, 256>}, {transform_indices = @transform_3, window_bounds = array<i64: 32, 128>}, {transform_indices = @transform_4, window_bounds = array<i64: 32, 256>}, {transform_indices = @transform_5, window_bounds = array<i64: 32, 1>}]} {
    %c0 = arith.constant 0 : index
    %c0_0 = arith.constant 0 : index
    %0 = vector.load %arg1[%c0, %c0_0] : memref<32x256xbf16, #tpu.memory_space<vmem>>, vector<32x256xbf16>
    %c0_1 = arith.constant 0 : index
    %c0_2 = arith.constant 0 : index
    %1 = vector.load %arg2[%c0_1, %c0_2] : memref<256x128xbf16, #tpu.memory_space<vmem>>, vector<256x128xbf16>
    %cst = arith.constant dense<0.000000e+00> : vector<32x128xf32>
    %2 = tpu.matmul %0, %1, %cst {dimension_numbers = #tpu.dot_dimension_numbers<[1], [0], [0], [1], [0, 0, 1, 1], [], []>} : vector<32x256xbf16>, vector<256x128xbf16>, vector<32x128xf32> -> vector<32x128xf32>
    %3 = arith.truncf %2 : vector<32x128xf32> to vector<32x128xbf16>
    %c0_3 = arith.constant 0 : index
    %c0_4 = arith.constant 0 : index
    %4 = vector.load %arg4[%c0_3, %c0_4] : memref<32x128xbf16, #tpu.memory_space<vmem>>, vector<32x128xbf16>
    tpu.vector_store %arg4[%c0_3, %c0_4], %3 {strides = array<i32>} : memref<32x128xbf16, #tpu.memory_space<vmem>>, vector<32x128xbf16>,
    %c0_5 = arith.constant 0 : index
    %c0_6 = arith.constant 0 : index
    %5 = vector.load %arg3[%c0_5, %c0_6] : memref<128x256xbf16, #tpu.memory_space<vmem>>, vector<128x256xbf16>
    %cst_7 = arith.constant dense<0.000000e+00> : vector<32x256xf32>
    %6 = tpu.matmul %3, %5, %cst_7 {dimension_numbers = #tpu.dot_dimension_numbers<[1], [0], [0], [1], [0, 0, 1, 1], [], []>} : vector<32x128xbf16>, vector<128x256xbf16>, vector<32x256xf32> -> vector<32x256xf32>
    %c0_8 = arith.constant 0 : index
    %c0_9 = arith.constant 0 : index
    %7 = vector.load %arg5[%c0_8, %c0_9] : memref<32x256xf32, #tpu.memory_space<vmem>>, vector<32x256xf32>
    tpu.vector_store %arg5[%c0_8, %c0_9], %6 {strides = array<i32>} : memref<32x256xf32, #tpu.memory_space<vmem>>, vector<32x256xf32>,
    %cst_10 = arith.constant dense<0.000000e+00> : vector<32xf32>
    %8 = vector.multi_reduction <add>, %6, %cst_10 [1] : vector<32x256xf32> to vector<32xf32>
    %9 = vector.shape_cast %8 : vector<32xf32> to vector<32x1xf32>
    %cst_11 = arith.constant 2.560000e+02 : f32
    %10 = vector.broadcast %cst_11 : f32 to vector<32x1xf32>
    %11 = arith.divf %9, %10 : vector<32x1xf32>
    %12 = vector.broadcast %11 : vector<32x1xf32> to vector<32x256xf32>
    %13 = arith.subf %6, %12 : vector<32x256xf32>
    %14 = arith.mulf %13, %13 : vector<32x256xf32>
    %cst_12 = arith.constant dense<0.000000e+00> : vector<32xf32>
    %15 = vector.multi_reduction <add>, %14, %cst_12 [1] : vector<32x256xf32> to vector<32xf32>
    %16 = vector.shape_cast %15 : vector<32xf32> to vector<32x1xf32>
    %cst_13 = arith.constant 2.560000e+02 : f32
    %17 = vector.broadcast %cst_13 : f32 to vector<32x1xf32>
    %18 = arith.divf %16, %17 : vector<32x1xf32>
    %19 = math.sqrt %18 : vector<32x1xf32>
    %c0_14 = arith.constant 0 : index
    %c0_15 = arith.constant 0 : index
    %20 = vector.load %arg6[%c0_14, %c0_15] : memref<32x1xf32, #tpu.memory_space<vmem>>, vector<32x1xf32>
    tpu.vector_store %arg6[%c0_14, %c0_15], %19 {strides = array<i32>} : memref<32x1xf32, #tpu.memory_space<vmem>>, vector<32x1xf32>,
    return
  }
  func.func @transform_0(%arg0: i32) -> (i32, i32) {
    %c0_i32 = arith.constant 0 : i32
    %c0_i32_0 = arith.constant 0 : i32
    return %arg0, %c0_i32 : i32, i32
  }
  func.func @transform_1(%arg0: i32) -> (i32, i32) {
    %c0_i32 = arith.constant 0 : i32
    %c0_i32_0 = arith.constant 0 : i32
    %c0_i32_1 = arith.constant 0 : i32
    return %c0_i32, %c0_i32_0 : i32, i32
  }
  func.func @transform_2(%arg0: i32) -> (i32, i32) {
    %c0_i32 = arith.constant 0 : i32
    %c0_i32_0 = arith.constant 0 : i32
    %c0_i32_1 = arith.constant 0 : i32
    return %c0_i32, %c0_i32_0 : i32, i32
  }
  func.func @transform_3(%arg0: i32) -> (i32, i32) {
    %c0_i32 = arith.constant 0 : i32
    %c0_i32_0 = arith.constant 0 : i32
    return %arg0, %c0_i32 : i32, i32
  }
  func.func @transform_4(%arg0: i32) -> (i32, i32) {
    %c0_i32 = arith.constant 0 : i32
    %c0_i32_0 = arith.constant 0 : i32
    return %arg0, %c0_i32 : i32, i32
  }
  func.func @transform_5(%arg0: i32) -> (i32, i32) {
    %c0_i32 = arith.constant 0 : i32
    %c0_i32_0 = arith.constant 0 : i32
    return %arg0, %c0_i32 : i32, i32
  }
}

</mosaic_0001>

<bundles_post_ra>
// kernel: tpu_custom_call.1
= control target key start
LH: loop header
LB: loop body
LE: loop exit
PB: predicated region body
PF: predicated region fallthrough
CT: control target
= control target key end

     0   :  { %11 = vsyncpa [#allocation3], 0  ;;  %s957_s0 = inlined_call_operand.hbm [shape: bf16[32,256], index: 0, kind: input, shape index: {}]   ;;  %s958_s1 = inlined_call_operand.hbm [shape: bf16[256,128], index: 1, kind: input, shape index: {}]   ;;  %s959_s2 = inlined_call_operand.hbm [shape: bf16[128,256], index: 2, kind: input, shape index: {}]   ;;  %s960_s3 = inlined_call_operand.hbm [shape: bf16[32,128], index: 3, kind: output, shape index: {0}]   ;;  %s961_s4 = inlined_call_operand.hbm [shape: f32[32,256], index: 4, kind: output, shape index: {1}]   ;;  %s962_s5 = inlined_call_operand.vmem [shape: f32[32,1], index: 5, kind: output, shape index: {2}]  }
   0x1   :  { %12 = vsyncpa [#allocation6], 0 }
   0x2   :  { %13 = vsyncpa [#allocation4], 0 }
   0x3   :  { %14 = vsyncpa [#allocation10], 0  ;;  %s826_s18 = smov [#allocation5]   ;;  %s708_s22 = scalar_lea.hbm %s958_s1, 2048 }
   0x4   :  { %s32_s19 = sshll.u32 %s826_s18, 4  ;;  %p709_p0 = scmp.ne.s32.totalorder %s958_s1, %s708_s22  ;;  %s33_s19 = int_to_ptr.vmem [resolvable:$true] %s32_s19 }
   0x5   :  { %p712_p1 = scmp.lt.u32.totalorder %s708_s22, %s958_s1 }
   0x7   :  { %p714_p2 = pnand %p712_p1, %p709_p0 }
   0x9   :  { %717 = shalt.err (!%p714_p2)
}
   0xa   :  { %s718_s27 = scalar_lea.vmem %s33_s19, 2048  ;;  %p723_p4 = scmp.lt.s32.totalorder %s33_s19, %s33_s19 }
   0xb   :  { %p719_p3 = scmp.ne.s32.totalorder %s33_s19, %s718_s27  ;;  %p724_p5 = scmp.lt.s32.totalorder %s718_s27, %s718_s27 }
   0xd   :  { %p725_p6 = por %p724_p5, %p723_p4 }
   0xf   :  { %p726_p7 = pnand %p725_p6, %p719_p3 }
  0x11   :  { %729 = shalt.err (!%p726_p7)
}
  0x12   :  { %s827_s28 = smov 64   ;;  %s828_s29 = smov 4  }
  0x13   :  { %38 = dma.hbm_to_vmem [thread:$0]  %s958_s1, 2048, %s33_s19, [#allocation6], %s827_s28, %s827_s28, %s828_s29  }
  0x14   :  { %s829_s7 = smov [#allocation2]   ;;  %s730_s11 = scalar_lea.hbm %s957_s0, 512 }
  0x15   :  { %s20_s8 = sshll.u32 %s829_s7, 4  ;;  %p731_p8 = scmp.ne.s32.totalorder %s957_s0, %s730_s11  ;;  %s21_s8 = int_to_ptr.vmem [resolvable:$true] %s20_s8 }
  0x16   :  { %p734_p9 = scmp.lt.u32.totalorder %s730_s11, %s957_s0 }
  0x18   :  { %p736_p10 = pnand %p734_p9, %p731_p8 }
  0x1a   :  { %739 = shalt.err (!%p736_p10)
}
  0x1b   :  { %s740_s16 = scalar_lea.vmem %s21_s8, 512  ;;  %p745_p12 = scmp.lt.s32.totalorder %s21_s8, %s21_s8 }
  0x1c   :  { %p741_p11 = scmp.ne.s32.totalorder %s21_s8, %s740_s16  ;;  %p746_p13 = scmp.lt.s32.totalorder %s740_s16, %s740_s16 }
  0x1e   :  { %p747_p0 = por %p746_p13, %p745_p12 }
  0x20   :  { %p748_p1 = pnand %p747_p0, %p741_p11 }
  0x22   :  { %751 = shalt.err (!%p748_p1)
}
  0x23   :  { %s830_s1 = smov 128   ;;  %s831_s17 = smov 8  }
  0x24   :  { %26 = dma.hbm_to_vmem [thread:$0]  %s957_s0, 512, %s21_s8, [#allocation3], %s830_s1, %s830_s1, %s831_s17  }
  0x25   :  { %s832_s20 = smov [#allocation7]   ;;  %s752_s24 = scalar_lea.hbm %s959_s2, 2048 }
  0x26   :  { %s44_s21 = sshll.u32 %s832_s20, 4  ;;  %p753_p2 = scmp.ne.s32.totalorder %s959_s2, %s752_s24  ;;  %s45_s21 = int_to_ptr.vmem [resolvable:$true] %s44_s21 }
  0x27   :  { %p756_p3 = scmp.lt.u32.totalorder %s752_s24, %s959_s2 }
  0x29   :  { %p758_p4 = pnand %p756_p3, %p753_p2 }
  0x2b   :  { %761 = shalt.err (!%p758_p4)
}
  0x2c   :  { %s762_s6 = scalar_lea.vmem %s45_s21, 2048  ;;  %p767_p6 = scmp.lt.s32.totalorder %s45_s21, %s45_s21 }
  0x2d   :  { %p763_p5 = scmp.ne.s32.totalorder %s45_s21, %s762_s6  ;;  %p768_p7 = scmp.lt.s32.totalorder %s762_s6, %s762_s6 }
  0x2f   :  { %p769_p8 = por %p768_p7, %p767_p6 }
  0x31   :  { %p770_p9 = pnand %p769_p8, %p763_p5 }
  0x33   :  { %773 = shalt.err (!%p770_p9)
}
  0x34   :  { %50 = dma.hbm_to_vmem [thread:$0]  %s959_s2, 2048, %s45_s21, [#allocation6], %s830_s1, %s830_s1, %s831_s17  }
  0x35   :  { %818 = dma.done.wait [#allocation3], 512  }
  0x36   :  { %819 = vsyncadd [#allocation3], 4294966784 }
  0x37   :  { %820 = dma.done.wait [#allocation6], 4096  }
  0x38   :  { %821 = vsyncadd [#allocation6], 4294963200  ;;  %v654_v0 = vld [vmem:[#allocation5 + $0x40] sm:$0xff]   ;;  %v656_v2 = vld [vmem:[#allocation5 + $0x48] sm:$0xff]   ;;  %v833_v36 = vmov 0   ;;  %s834_s2 = smov [#allocation8]  }
  0x39   :  { %v655_v1 = vld [vmem:[#allocation5] sm:$0xff]   ;;  %614 = vmatprep.subr.bf16.mxu0 %v654_v0  ;;  %v657_v3 = vld [vmem:[#allocation5 + $0x8] sm:$0xff]   ;;  %v658_v4 = vld [vmem:[#allocation5 + $0x50] sm:$0xff]   ;;  %410 = vmatprep.mubr.bf16.mxu1 %v833_v36  ;;  %s526_s8 = sshll.u32 %s834_s2, 4  ;;  %s835_s9 = smov [#allocation9]   ;;  %s527_s8 = int_to_ptr.vmem [resolvable:$true] %s526_s8 }
  0x3a   :  { %615 = vmatpush3.bf16.msra.mxu0 %v655_v1  ;;  %v659_v5 = vld [vmem:[#allocation5 + $0x10] sm:$0xff]   ;;  %v660_v6 = vld [vmem:[#allocation5 + $0x58] sm:$0xff]   ;;  %v662_v8 = vld [vmem:[#allocation5 + $0x60] sm:$0xff]   ;;  %s538_s10 = sshll.u32 %s835_s9, 4  ;;  %s774_s11 = scalar_lea.vmem %s527_s8, 256  ;;  %s907_s10 = int_to_ptr.vmem [resolvable:$true] %s538_s10 }
  0x3b   :  { %616 = vmatprep.subr.bf16.mxu0 %v656_v2  ;;  %v661_v7 = vld [vmem:[#allocation5 + $0x18] sm:$0xff]   ;;  %v663_v9 = vld [vmem:[#allocation5 + $0x20] sm:$0xff]   ;;  %v664_v10 = vld [vmem:[#allocation5 + $0x68] sm:$0xff]   ;;  %p775_p10 = scmp.ne.s32.totalorder %s527_s8, %s774_s11  ;;  %p779_p11 = scmp.lt.s32.totalorder %s527_s8, %s527_s8 }
  0x3c   :  { %v672_v11 = vld [vmem:[#allocation2 + $0x4] ss:$8 sps:$4 sm:$0xff]   ;;  %v666_v13 = vld [vmem:[#allocation5 + $0x70] sm:$0xff]   ;;  %v678_v15 = vld [vmem:[#allocation7] ss:$8 sps:$4 sm:$0xff]   ;;  %p780_p12 = scmp.lt.s32.totalorder %s774_s11, %s774_s11 }
  0x3d   :  { %v665_v12 = vld [vmem:[#allocation5 + $0x28] sm:$0xff]   ;;  %245 = vmatprep.mubr.bf16.mxu0 %v672_v11  ;;  %v679_v16 = vld [vmem:[#allocation7 + $0x14] ss:$8 sps:$4 sm:$0xff]   ;;  %v681_v17 = vld [vmem:[#allocation7 + $0x10] ss:$8 sps:$4 sm:$0xff]  }
  0x3e   :  { %617 = vmatpush3.bf16.msra.mxu0 %v657_v3  ;;  %v676_v14 = vld [vmem:[#allocation7 + $0x4] ss:$8 sps:$4 sm:$0xff]   ;;  %v667_v18 = vld [vmem:[#allocation5 + $0x30] sm:$0xff]   ;;  %v668_v20 = vld [vmem:[#allocation5 + $0x78] sm:$0xff]   ;;  %p781_p13 = por %p780_p12, %p779_p11 }
  0x3f   :  { %618 = vmatprep.subr.bf16.mxu0 %v658_v4  ;;  %378 = vmatprep.subr.bf16.mxu1 %v676_v14  ;;  %v682_v19 = vld [vmem:[#allocation7 + $0x24] ss:$8 sps:$4 sm:$0xff]   ;;  %v669_v21 = vld [vmem:[#allocation5 + $0x38] sm:$0xff]   ;;  %v684_v22 = vld [vmem:[#allocation7 + $0x20] ss:$8 sps:$4 sm:$0xff]  }
  0x40   :  { %379 = vmatpush1.bf16.msra.mxu1 %v678_v15  ;;  %v685_v23 = vld [vmem:[#allocation7 + $0x34] ss:$8 sps:$4 sm:$0xff]   ;;  %v670_v24 = vld [vmem:[#allocation2] ss:$8 sps:$4 sm:$0xff]   ;;  %v687_v25 = vld [vmem:[#allocation7 + $0x30] ss:$8 sps:$4 sm:$0xff]   ;;  %p782_p0 = pnand %p781_p13, %p775_p10 }
  0x41   :  { %380 = vmatprep.subr.bf16.mxu1 %v679_v16  ;;  %v673_v26 = vld [vmem:[#allocation2 + $0x14] ss:$8 sps:$4 sm:$0xff]   ;;  %v688_v27 = vld [vmem:[#allocation7 + $0x44] ss:$8 sps:$4 sm:$0xff]   ;;  %v690_v28 = vld [vmem:[#allocation7 + $0x40] ss:$8 sps:$4 sm:$0xff]  }
  0x42   :  { %619 = vmatpush3.bf16.msra.mxu0 %v659_v5  ;;  %v691_v29 = vld [vmem:[#allocation7 + $0x54] ss:$8 sps:$4 sm:$0xff]   ;;  %v675_v30 = vld [vmem:[#allocation2 + $0x10] ss:$8 sps:$4 sm:$0xff]   ;;  %v694_v32 = vld [vmem:[#allocation7 + $0x64] ss:$8 sps:$4 sm:$0xff]  }
  0x43   :  { %620 = vmatprep.subr.bf16.mxu0 %v660_v6  ;;  %v693_v31 = vld [vmem:[#allocation7 + $0x50] ss:$8 sps:$4 sm:$0xff]   ;;  %v696_v33 = vld [vmem:[#allocation7 + $0x60] ss:$8 sps:$4 sm:$0xff]   ;;  %v697_v34 = vld [vmem:[#allocation7 + $0x74] ss:$8 sps:$4 sm:$0xff]  }
  0x44   :  { %381 = vmatpush1.bf16.msra.mxu1 %v681_v17  ;;  %v699_v35 = vld [vmem:[#allocation7 + $0x70] ss:$8 sps:$4 sm:$0xff]  }
  0x45   :  { %382 = vmatprep.subr.bf16.mxu1 %v682_v19 }
  0x46   :  { %621 = vmatpush3.bf16.msra.mxu0 %v661_v7 }
  0x47   :  { %622 = vmatprep.subr.bf16.mxu0 %v662_v8 }
  0x48   :  { %383 = vmatpush1.bf16.msra.mxu1 %v684_v22 }
  0x49   :  { %384 = vmatprep.subr.bf16.mxu1 %v685_v23 }
  0x4a   :  { %623 = vmatpush3.bf16.msra.mxu0 %v663_v9 }
  0x4b   :  { %624 = vmatprep.subr.bf16.mxu0 %v664_v10 }
  0x4c   :  { %385 = vmatpush1.bf16.msra.mxu1 %v687_v25 }
  0x4d   :  { %386 = vmatprep.subr.bf16.mxu1 %v688_v27 }
  0x4e   :  { %625 = vmatpush3.bf16.msra.mxu0 %v665_v12 }
  0x4f   :  { %626 = vmatprep.subr.bf16.mxu0 %v666_v13 }
  0x50   :  { %387 = vmatpush1.bf16.msra.mxu1 %v690_v28 }
  0x51   :  { %388 = vmatprep.subr.bf16.mxu1 %v691_v29 }
  0x52   :  { %627 = vmatpush3.bf16.msra.mxu0 %v667_v18 }
  0x53   :  { %628 = vmatprep.subr.bf16.mxu0 %v668_v20 }
  0x54   :  { %389 = vmatpush1.bf16.msra.mxu1 %v693_v31 }
  0x55   :  { %390 = vmatprep.subr.bf16.mxu1 %v694_v32 }
  0x56   :  { %629 = vmatpush3.bf16.msra.mxu0 %v669_v21 }
  0x58   :  { %391 = vmatpush1.bf16.msra.mxu1 %v696_v33 }
  0x59   :  { %246 = vmatmul.mubr.bf16.vlgmr.msra.gmra.mrb[0].mxu0 %v670_v24  ;;  %392 = vmatprep.subr.bf16.mxu1 %v697_v34 }
  0x5a   :  { %253 = vmatprep.mubr.bf16.mxu0 %v673_v26 }
  0x5c   :  { %393 = vmatpush1.bf16.msra.mxu1 %v699_v35 }
  0x61   :  { %254 = vmatmul.mubr.bf16.gmra.mrb[4].mxu0 %v675_v30 }
 0x12c   :  { %v630_v37 = vpop.f32.mrb[0].mxu0 }
 0x12d   :  { %v631_v38 = vpop.f32.mrb[1].mxu0 }
 0x12e   :  { %v632_v39 = vadd.f32 %v631_v38, %v630_v37  ;;  %v633_v40 = vpop.f32.mrb[2].mxu0 }
 0x12f   :  { %v634_v41 = vpop.f32.mrb[3].mxu0 }
 0x130   :  { %v635_v42 = vadd.f32 %v634_v41, %v633_v40 }
 0x132   :  { %v262_v43 = vpack.c.bf16 %v635_v42, %v632_v39 }
 0x134   :  { %607 = vst [vmem:[#allocation8] sm:$0xff] %v262_v43   ;;  %v636_v44 = vpop.f32.mrb[4].mxu0  ;;  %411 = vmatmul.mubr.bf16.vlgmr.msra.gmra.mrb[0].mxu1 %v262_v43 }
 0x135   :  { %v637_v45 = vpop.f32.mrb[5].mxu0  ;;  %420 = vmatprep.mubr.bf16.mxu1 %v833_v36 }
 0x136   :  { %v638_v46 = vadd.f32 %v637_v45, %v636_v44  ;;  %v639_v47 = vpop.f32.mrb[6].mxu0 }
 0x137   :  { %v640_v48 = vpop.f32.mrb[7].mxu0 }
 0x138   :  { %v641_v49 = vadd.f32 %v640_v48, %v639_v47 }
 0x13a   :  { %v263_v50 = vpack.c.bf16 %v641_v49, %v638_v46 }
 0x13c   :  { %613 = vst [vmem:[#allocation8 + $0x8] sm:$0xff] %v263_v50   ;;  %421 = vmatmul.mubr.bf16.gmra.mrb[4].mxu1 %v263_v50 }
 0x207   :  { %v412_v51 = vpop.f32.mrb[0].mxu1 }
 0x208   :  { %431 = vst [vmem:[#allocation9] sm:$0xff] %v412_v51  ;;  %v414_v52 = vpop.f32.mrb[1].mxu1 }
 0x209   :  { %432 = vst [vmem:[#allocation9 + $0x8] sm:$0xff] %v414_v52  ;;  %v416_v53 = vpop.f32.mrb[2].mxu1  ;;  %v439_v54 = vadd.f32 %v414_v52, %v412_v51 }
 0x20a   :  { %433 = vst [vmem:[#allocation9 + $0x10] sm:$0xff] %v416_v53  ;;  %v418_v55 = vpop.f32.mrb[3].mxu1 }
 0x20b   :  { %434 = vst [vmem:[#allocation9 + $0x18] sm:$0xff] %v418_v55  ;;  %440 = vadd.xlane.f32.xlu0 %v439_v54  ;;  %v442_v56 = vadd.f32 %v418_v55, %v416_v53 }
 0x20f   :  { %443 = vadd.xlane.f32.xlu0 %v442_v56  ;;  %v422_v57 = vpop.f32.mrb[4].mxu1 }
 0x210   :  { %435 = vst [vmem:[#allocation9 + $0x20] sm:$0xff] %v422_v57  ;;  %v424_v58 = vpop.f32.mrb[5].mxu1 }
 0x211   :  { %436 = vst [vmem:[#allocation9 + $0x28] sm:$0xff] %v424_v58  ;;  %v426_v59 = vpop.f32.mrb[6].mxu1  ;;  %v445_v60 = vadd.f32 %v424_v58, %v422_v57 }
 0x212   :  { %437 = vst [vmem:[#allocation9 + $0x30] sm:$0xff] %v426_v59  ;;  %v428_v61 = vpop.f32.mrb[7].mxu1 }
 0x213   :  { %438 = vst [vmem:[#allocation9 + $0x38] sm:$0xff] %v428_v61  ;;  %446 = vadd.xlane.f32.xlu1 %v445_v60  ;;  %v448_v62 = vadd.f32 %v428_v61, %v426_v59 }
 0x217   :  { %449 = vadd.xlane.f32.xlu1 %v448_v62 }
 0x298   :  { %v441_v63 = vpop.xlane.xlu0 %440 }
 0x299   :  { %v452_v0 = vmul.f32 0.00390625, %v441_v63 }
 0x29b   :  { %v456_v1 = vsub.f32 %v412_v51, %v452_v0  ;;  %v457_v2 = vsub.f32 %v414_v52, %v452_v0 }
 0x29c   :  { %v444_v3 = vpop.xlane.xlu0 %443 }
 0x29d   :  { %v464_v4 = vmul.f32 %v456_v1, %v456_v1  ;;  %v465_v5 = vmul.f32 %v457_v2, %v457_v2  ;;  %v453_v6 = vmul.f32 0.00390625, %v444_v3 }
 0x29f   :  { %v458_v7 = vsub.f32 %v416_v53, %v453_v6  ;;  %v459_v8 = vsub.f32 %v418_v55, %v453_v6  ;;  %v472_v9 = vadd.f32 %v465_v5, %v464_v4 }
 0x2a0   :  { %v447_v10 = vpop.xlane.xlu1 %446 }
 0x2a1   :  { %v466_v11 = vmul.f32 %v458_v7, %v458_v7  ;;  %v467_v12 = vmul.f32 %v459_v8, %v459_v8  ;;  %v454_v13 = vmul.f32 0.00390625, %v447_v10  ;;  %473 = vadd.xlane.f32.xlu0 %v472_v9 }
 0x2a3   :  { %v460_v14 = vsub.f32 %v422_v57, %v454_v13  ;;  %v461_v15 = vsub.f32 %v424_v58, %v454_v13  ;;  %v475_v16 = vadd.f32 %v467_v12, %v466_v11 }
 0x2a4   :  { %v450_v17 = vpop.xlane.xlu1 %449 }
 0x2a5   :  { %v468_v18 = vmul.f32 %v460_v14, %v460_v14  ;;  %v469_v19 = vmul.f32 %v461_v15, %v461_v15  ;;  %v455_v20 = vmul.f32 0.00390625, %v450_v17  ;;  %476 = vadd.xlane.f32.xlu1 %v475_v16 }
 0x2a7   :  { %v462_v21 = vsub.f32 %v426_v59, %v455_v20  ;;  %v463_v22 = vsub.f32 %v428_v61, %v455_v20  ;;  %v478_v23 = vadd.f32 %v469_v19, %v468_v18 }
 0x2a9   :  { %v470_v24 = vmul.f32 %v462_v21, %v462_v21  ;;  %v471_v25 = vmul.f32 %v463_v22, %v463_v22  ;;  %479 = vadd.xlane.f32.xlu0 %v478_v23 }
 0x2ab   :  { %v481_v26 = vadd.f32 %v471_v25, %v470_v24 }
 0x2ad   :  { %482 = vadd.xlane.f32.xlu1 %v481_v26 }
 0x2ae   :  { %785 = shalt.err (!%p782_p0)
}
 0x2af   :  { %s786_s14 = scalar_lea.hbm %s960_s3, 256 }
 0x2b0   :  { %p787_p1 = scmp.ne.s32.totalorder %s960_s3, %s786_s14  ;;  %p790_p2 = scmp.lt.u32.totalorder %s786_s14, %s960_s3 }
 0x2b2   :  { %p792_p3 = pnand %p790_p2, %p787_p1 }
 0x2b4   :  { %795 = shalt.err (!%p792_p3)
}
 0x2b5   :  { %532 = dma.vmem_to_hbm [thread:$0]  %s527_s8, 256, %s960_s3, [#allocation4], %s827_s28, %s827_s28, %s828_s29  }
 0x2b6   :  { %s796_s20 = scalar_lea.vmem %s907_s10, 1024  ;;  %p801_p5 = scmp.lt.s32.totalorder %s907_s10, %s907_s10 }
 0x2b7   :  { %p797_p4 = scmp.ne.s32.totalorder %s907_s10, %s796_s20  ;;  %p802_p6 = scmp.lt.s32.totalorder %s796_s20, %s796_s20 }
 0x2b9   :  { %p803_p7 = por %p802_p6, %p801_p5 }
 0x2bb   :  { %p804_p8 = pnand %p803_p7, %p797_p4 }
 0x2bd   :  { %807 = shalt.err (!%p804_p8)
}
 0x2be   :  { %s808_s23 = scalar_lea.hbm %s961_s4, 1024 }
 0x2bf   :  { %p809_p9 = scmp.ne.s32.totalorder %s961_s4, %s808_s23  ;;  %p812_p10 = scmp.lt.u32.totalorder %s808_s23, %s961_s4 }
 0x2c1   :  { %p814_p11 = pnand %p812_p10, %p809_p9 }
 0x2c3   :  { %817 = shalt.err (!%p814_p11)
}
 0x2c4   :  { %s836_s3 = smov 256   ;;  %s837_s28 = smov 16   ;;  %vm516_vm0 = vcmask 7168  }
 0x2c5   :  { %544 = dma.vmem_to_hbm [thread:$0]  %s907_s10, 1024, %s961_s4, [#allocation10], %s836_s3, %s836_s3, %s837_s28  }
 0x32e   :  { %v474_v27 = vpop.xlane.xlu0 %473 }
 0x32f   :  { %v484_v28 = vmul.f32 0.00390625, %v474_v27 }
 0x331   :  { %700 = vrsqrt.f32 %v484_v28  ;;  %vm490_vm1 = vcmp.eq.f32.partialorder %v484_v28, inf  ;;  %v493_v37 = vand.u32 2147483648, %v484_v28  ;;  %vm492_vm2 = vcmp.eq.f32.partialorder %v484_v28, 0.0 }
 0x332   :  { %v477_v29 = vpop.xlane.xlu1 %476 }
 0x333   :  { %v485_v30 = vmul.f32 0.00390625, %v477_v29 }
 0x335   :  { %702 = vrsqrt.f32 %v485_v30  ;;  %vm497_vm3 = vcmp.eq.f32.partialorder %v485_v30, inf  ;;  %v500_v42 = vand.u32 2147483648, %v485_v30  ;;  %vm499_vm4 = vcmp.eq.f32.partialorder %v485_v30, 0.0 }
 0x336   :  { %v480_v31 = vpop.xlane.xlu0 %479 }
 0x337   :  { %v486_v32 = vmul.f32 0.00390625, %v480_v31 }
 0x339   :  { %704 = vrsqrt.f32 %v486_v32  ;;  %vm504_vm5 = vcmp.eq.f32.partialorder %v486_v32, inf  ;;  %v507_v47 = vand.u32 2147483648, %v486_v32  ;;  %vm506_vm6 = vcmp.eq.f32.partialorder %v486_v32, 0.0 }
 0x33a   :  { %v483_v33 = vpop.xlane.xlu1 %482 }
 0x33b   :  { %v701_v34 = vpop.eup %700  ;;  %v487_v35 = vmul.f32 0.00390625, %v483_v33 }
 0x33c   :  { %v489_v36 = vmul.f32 %v701_v34, %v484_v28 }
 0x33d   :  { %706 = vrsqrt.f32 %v487_v35  ;;  %vm511_vm7 = vcmp.eq.f32.partialorder %v487_v35, inf  ;;  %v514_v52 = vand.u32 2147483648, %v487_v35  ;;  %vm513_vm8 = vcmp.eq.f32.partialorder %v487_v35, 0.0 }
 0x33e   :  { %v491_v38 = vsel %vm490_vm1, %v484_v28, %v489_v36 }
 0x33f   :  { %v703_v39 = vpop.eup %702  ;;  %v494_v40 = vsel %vm492_vm2, %v493_v37, %v491_v38 }
 0x340   :  { %517 = vst.msk [vmem:[%s962_s5] sm:$0xff] %vm516_vm0, %v494_v40  ;;  %v496_v41 = vmul.f32 %v703_v39, %v485_v30 }
 0x342   :  { %v498_v43 = vsel %vm497_vm3, %v485_v30, %v496_v41 }
 0x343   :  { %v705_v44 = vpop.eup %704  ;;  %v501_v45 = vsel %vm499_vm4, %v500_v42, %v498_v43 }
 0x344   :  { %518 = vst.msk [vmem:[%s962_s5 + $0x8] sm:$0xff] %vm516_vm0, %v501_v45  ;;  %v503_v46 = vmul.f32 %v705_v44, %v486_v32 }
 0x346   :  { %v505_v48 = vsel %vm504_vm5, %v486_v32, %v503_v46 }
 0x347   :  { %v707_v49 = vpop.eup %706  ;;  %v508_v50 = vsel %vm506_vm6, %v507_v47, %v505_v48 }
 0x348   :  { %519 = vst.msk [vmem:[%s962_s5 + $0x10] sm:$0xff] %vm516_vm0, %v508_v50  ;;  %v510_v51 = vmul.f32 %v707_v49, %v487_v35 }
 0x34a   :  { %v512_v53 = vsel %vm511_vm7, %v487_v35, %v510_v51 }
 0x34b   :  { %v515_v54 = vsel %vm513_vm8, %v514_v52, %v512_v53 }
 0x34c   :  { %520 = vst.msk [vmem:[%s962_s5 + $0x18] sm:$0xff] %vm516_vm0, %v515_v54 }
 0x34d   :  { %822 = dma.done.wait [#allocation4], 256  }
 0x34e   :  { %823 = vsyncadd [#allocation4], 4294967040 }
 0x34f   :  { %824 = dma.done.wait [#allocation10], 1024  }
 0x350   :  { %825 = vsyncadd [#allocation10], 4294966272 }
 0x351   :  { %555 = vsyncpa [#allocation3], 1 }
 0x352   :  { %556 = vsyncpa [#allocation6], 1 }
 0x353   :  { %557 = vsyncpa [#allocation4], 1 }
 0x354   :  { %558 = vsyncpa [#allocation10], 1 }

</bundles_post_ra>
